<compile_context>
chip_gen: v6e
topology: v6e:2x2x1
jax: 0.10.0
libtpu: 0.0.40
codegen_flags: <defaults>
</compile_context>

<pallas_src>
import math

import jax
import jax.numpy as jnp
from jax.experimental import pallas as pl
from jax.experimental.pallas import tpu as pltpu


def make_pos_enc(d_model: int, max_seq_len: int = 6) -> jnp.ndarray:
    """Deterministic buffer construction, mirrors PositionalEncoding.__init__."""
    pos = jnp.arange(0, max_seq_len, dtype=jnp.float32)[:, None]            # [S, 1]
    div_term = jnp.exp(
        jnp.arange(0, d_model, 2, dtype=jnp.float32) * (-math.log(10000.0) / d_model)
    )                                                                        # [D/2]
    angles = pos * div_term                                                  # [S, D/2]
    pe = jnp.zeros((max_seq_len, d_model), dtype=jnp.float32)
    pe = pe.at[:, 0::2].set(jnp.sin(angles))
    pe = pe.at[:, 1::2].set(jnp.cos(angles))
    return pe[None, :, :]                                                    # [1, S, D]


def _pe_add_kernel(x_ref, pe_ref, o_ref):
    # Pure VPU elementwise add; pe broadcasts over the batch(-tile) axis.
    o_ref[...] = x_ref[...] + pe_ref[...]


_TILE_BUDGET = 4 * 1024 * 1024        # target bytes per x tile (~2-4 MiB sweet spot)
_VMEM_LIMIT = 48 * 1024 * 1024        # 2*x + 2*out + pe stays well under this on v7x


def _plan_tiling(B: int, S: int, D: int, dtype) -> tuple[bool, int, int]:
    """Returns (flatten, batch_tile, lane_tile).

    flatten    : whether to view x as [B, S*D] (only when D < 128).
    batch_tile : rows of the batch axis per grid step.
    lane_tile  : lanes (of D, or of S*D when flattened) per grid step.
    """
    itemsize = jnp.dtype(dtype).itemsize
    granule = max(8, 32 // itemsize)          # sublane granule: 8 f32 / 16 bf16 / 32 i8

    flatten = D < 128
    if flatten:
        lane_full = S * D
        rows_per_elem = 1                      # sublane rows per batch element
        min_tb = min(B, granule)               # second-minor dim: granule multiple or full B
    else:
        lane_full = D
        rows_per_elem = S                      # second-minor dim is S (full extent, always ok)
        min_tb = 1

    def tile_bytes(tb_, tl_):
        return tb_ * rows_per_elem * tl_ * itemsize

    # Lane-axis tile: full extent if a minimum-height tile fits the budget,
    # otherwise the largest 128-multiple that does.
    if lane_full <= 128 or tile_bytes(min_tb, lane_full) <= _TILE_BUDGET:
        tl = lane_full
    else:
        max_lanes = _TILE_BUDGET // (min_tb * rows_per_elem * itemsize)
        tl = min(lane_full, max(128, (max_lanes // 128) * 128))

    # Batch-axis tile under the per-tile budget.
    tb = max(min_tb, _TILE_BUDGET // max(1, rows_per_elem * tl * itemsize))
    tb = min(tb, B)
    # Aim for >= 2 batch grid steps so v7x's two TensorCores both get work.
    if B > min_tb:
        tb = min(tb, (B + 1) // 2)
    if flatten and tb < B:
        # second-minor dim of a 2-D block must be a granule multiple (or full B)
        tb = max(granule, (tb // granule) * granule)
        if tb >= B:
            tb = B
    return flatten, tb, tl


def positional_encoding_forward(x: jnp.ndarray, pos_enc: jnp.ndarray) -> jnp.ndarray:
    """x: [B, S, D], pos_enc: [1, max_seq_len, D] -> [B, S, D]."""
    B, S, D = x.shape
    itemsize = jnp.dtype(x.dtype).itemsize

    # Glue: slice to the active sequence length, one-time dtype match.
    pe = pos_enc[:, :S, :].astype(x.dtype)                                   # [1, S, D]

    flatten, tb, tl = _plan_tiling(B, S, D, x.dtype)

    if flatten:
        # D < 128: widen the lane axis to S*D instead of a masked <128 slice.
        x_in = x.reshape(B, S * D)
        pe_in = pe.reshape(1, S * D)
        lane_full = S * D
        grid = (pl.cdiv(B, tb), pl.cdiv(lane_full, tl))
        x_block, x_map = (tb, tl), (lambda i, j: (i, j))
        pe_block, pe_map = (1, tl), (lambda i, j: (0, j))
        out_shape = jax.ShapeDtypeStruct((B, lane_full), x.dtype)
    else:
        # D is lane-dense already: no reshape, no HBM relayout copies.
        x_in = x
        pe_in = pe
        lane_full = D
        grid = (pl.cdiv(B, tb), pl.cdiv(lane_full, tl))
        x_block, x_map = (tb, S, tl), (lambda i, j: (i, 0, j))
        pe_block, pe_map = (1, S, tl), (lambda i, j: (0, 0, j))
        out_shape = jax.ShapeDtypeStruct((B, S, D), x.dtype)

    # pe is grid-invariant when the lane axis is a single step: single buffer.
    pe_single_buffer = (grid[1] == 1)

    def run(single_buffer_pe: bool):
        pe_kwargs = {"pipeline_mode": pl.Buffered(1)} if single_buffer_pe else {}
        return pl.pallas_call(
            _pe_add_kernel,
            out_shape=out_shape,
            grid_spec=pltpu.PrefetchScalarGridSpec(
                num_scalar_prefetch=0,
                grid=grid,
                in_specs=[
                    pl.BlockSpec(x_block, x_map),
                    pl.BlockSpec(pe_block, pe_map, **pe_kwargs),
                ],
                out_specs=pl.BlockSpec(x_block, x_map),
            ),
            compiler_params=pltpu.CompilerParams(
                dimension_semantics=("parallel", "parallel"),
                vmem_limit_bytes=_VMEM_LIMIT,
            ),
            cost_estimate=pl.CostEstimate(
                flops=B * S * D,
                transcendentals=0,
                bytes_accessed=itemsize * (2 * B * S * D + S * D),
            ),
        )(x_in, pe_in)

    try:
        out = run(pe_single_buffer)
    except Exception:
        # Fallback for Pallas versions that reject single-buffered pipeline mode;
        # only costs one extra pe-sized VMEM buffer.
        out = run(False)

    return out.reshape(B, S, D)


if __name__ == "__main__":
    # Shapes consistent with the module defaults: max_seq_len=6, small d_model.
    d_model = 32
    max_seq_len = 6
    B, S = 2, 6

    key = jax.random.PRNGKey(0)
    x = jax.random.normal(key, (B, S, d_model), dtype=jnp.float32)
    pos_enc = make_pos_enc(d_model, max_seq_len)

    out = jax.block_until_ready(positional_encoding_forward(x, pos_enc))
    ref = x + pos_enc[:, :S, :]
    assert out.shape == (B, S, d_model)
    assert jnp.allclose(out, ref, atol=1e-6, rtol=1e-6)

    # Exercise the 3-D lane-dense path (D % 128 == 0) with >= 2 batch grid steps.
    B2, S2, D2 = 16, 6, 128
    x2 = jax.random.normal(jax.random.PRNGKey(1), (B2, S2, D2), dtype=jnp.float32)
    pe2 = make_pos_enc(D2, max_seq_len=S2)
    out2 = jax.block_until_ready(positional_encoding_forward(x2, pe2))
    ref2 = x2 + pe2[:, :S2, :]
    assert jnp.allclose(out2, ref2, atol=1e-6, rtol=1e-6)

    print("KERNEL_OK")
</pallas_src>

<mosaic_0001>
module attributes {stable_mosaic.version = 11 : i64} {
  func.func @_pe_add_kernel(%arg0: i32, %arg1: i32, %arg2: memref<2x192xf32, #tpu.memory_space<vmem>>, %arg3: memref<1x192xf32, #tpu.memory_space<vmem>>, %arg4: memref<2x192xf32, #tpu.memory_space<vmem>>) attributes {dimension_semantics = [#tpu.dimension_semantics<parallel>, #tpu.dimension_semantics<parallel>], iteration_bounds = array<i64: 1, 1>, scalar_prefetch = 0 : i64, scratch_operands = 0 : i64, tpu.core_type = #tpu.core_type<tc>, window_params = [{transform_indices = @transform_0, window_bounds = array<i64: 2, 192>}, {pipeline_mode = #tpu.pipeline_mode<synchronous>, transform_indices = @transform_1, window_bounds = array<i64: 1, 192>}, {transform_indices = @transform_2, window_bounds = array<i64: 2, 192>}]} {
    %c0 = arith.constant 0 : index
    %c0_0 = arith.constant 0 : index
    %0 = vector.load %arg2[%c0, %c0_0] : memref<2x192xf32, #tpu.memory_space<vmem>>, vector<2x192xf32>
    %c0_1 = arith.constant 0 : index
    %c0_2 = arith.constant 0 : index
    %1 = vector.load %arg3[%c0_1, %c0_2] : memref<1x192xf32, #tpu.memory_space<vmem>>, vector<1x192xf32>
    %2 = vector.broadcast %1 : vector<1x192xf32> to vector<2x192xf32>
    %3 = arith.addf %0, %2 : vector<2x192xf32>
    %c0_3 = arith.constant 0 : index
    %c0_4 = arith.constant 0 : index
    %4 = vector.load %arg4[%c0_3, %c0_4] : memref<2x192xf32, #tpu.memory_space<vmem>>, vector<2x192xf32>
    tpu.vector_store %arg4[%c0_3, %c0_4], %3 {strides = array<i32>} : memref<2x192xf32, #tpu.memory_space<vmem>>, vector<2x192xf32>,
    return
  }
  func.func @transform_0(%arg0: i32, %arg1: i32) -> (i32, i32) {
    %c0_i32 = arith.constant 0 : i32
    return %arg0, %arg1 : i32, i32
  }
  func.func @transform_1(%arg0: i32, %arg1: i32) -> (i32, i32) {
    %c0_i32 = arith.constant 0 : i32
    %c0_i32_0 = arith.constant 0 : i32
    return %c0_i32, %arg1 : i32, i32
  }
  func.func @transform_2(%arg0: i32, %arg1: i32) -> (i32, i32) {
    %c0_i32 = arith.constant 0 : i32
    return %arg0, %arg1 : i32, i32
  }
}

module attributes {stable_mosaic.version = 11 : i64} {
  func.func @_pe_add_kernel(%arg0: i32, %arg1: i32, %arg2: memref<2x192xf32, #tpu.memory_space<vmem>>, %arg3: memref<1x192xf32, #tpu.memory_space<vmem>>, %arg4: memref<2x192xf32, #tpu.memory_space<vmem>>) attributes {dimension_semantics = [#tpu.dimension_semantics<parallel>, #tpu.dimension_semantics<parallel>], iteration_bounds = array<i64: 1, 1>, scalar_prefetch = 0 : i64, scratch_operands = 0 : i64, tpu.core_type = #tpu.core_type<tc>, window_params = [{transform_indices = @transform_0, window_bounds = array<i64: 2, 192>}, {transform_indices = @transform_1, window_bounds = array<i64: 1, 192>}, {transform_indices = @transform_2, window_bounds = array<i64: 2, 192>}]} {
    %c0 = arith.constant 0 : index
    %c0_0 = arith.constant 0 : index
    %0 = vector.load %arg2[%c0, %c0_0] : memref<2x192xf32, #tpu.memory_space<vmem>>, vector<2x192xf32>
    %c0_1 = arith.constant 0 : index
    %c0_2 = arith.constant 0 : index
    %1 = vector.load %arg3[%c0_1, %c0_2] : memref<1x192xf32, #tpu.memory_space<vmem>>, vector<1x192xf32>
    %2 = vector.broadcast %1 : vector<1x192xf32> to vector<2x192xf32>
    %3 = arith.addf %0, %2 : vector<2x192xf32>
    %c0_3 = arith.constant 0 : index
    %c0_4 = arith.constant 0 : index
    %4 = vector.load %arg4[%c0_3, %c0_4] : memref<2x192xf32, #tpu.memory_space<vmem>>, vector<2x192xf32>
    tpu.vector_store %arg4[%c0_3, %c0_4], %3 {strides = array<i32>} : memref<2x192xf32, #tpu.memory_space<vmem>>, vector<2x192xf32>,
    return
  }
  func.func @transform_0(%arg0: i32, %arg1: i32) -> (i32, i32) {
    %c0_i32 = arith.constant 0 : i32
    return %arg0, %arg1 : i32, i32
  }
  func.func @transform_1(%arg0: i32, %arg1: i32) -> (i32, i32) {
    %c0_i32 = arith.constant 0 : i32
    %c0_i32_0 = arith.constant 0 : i32
    return %c0_i32, %arg1 : i32, i32
  }
  func.func @transform_2(%arg0: i32, %arg1: i32) -> (i32, i32) {
    %c0_i32 = arith.constant 0 : i32
    return %arg0, %arg1 : i32, i32
  }
}

</mosaic_0001>

<bundles_post_ra>
// kernel: tpu_custom_call.1
= control target key start
LH: loop header
LB: loop body
LE: loop exit
PB: predicated region body
PF: predicated region fallthrough
CT: control target
= control target key end

     0   :  { %7 = vsyncpa [#allocation3], 0  ;;  %s175_s0 = inlined_call_operand.hbm [shape: f32[2,192], index: 0, kind: input, shape index: {}]   ;;  %s176_s1 = inlined_call_operand.hbm [shape: f32[1,192], index: 1, kind: input, shape index: {}]   ;;  %s177_s2 = inlined_call_operand.hbm [shape: f32[2,192], index: 2, kind: output, shape index: {}]  }
   0x1   :  { %8 = vsyncpa [#allocation6], 0 }
   0x2   :  { %9 = vsyncpa [#allocation4], 0  ;;  %s147_s9 = smov [#allocation2]   ;;  %s148_s11 = smov [#allocation5]  }
   0x3   :  { %s16_s10 = sshll.u32 %s147_s9, 4  ;;  %s26_s12 = sshll.u32 %s148_s11, 4  ;;  %s17_s10 = int_to_ptr.vmem [resolvable:$true] %s16_s10  ;;  %s27_s12 = int_to_ptr.vmem [resolvable:$true] %s26_s12 }
   0x4   :  { %s89_s13 = scalar_lea.vmem %s17_s10, 64  ;;  %p94_p1 = scmp.lt.s32.totalorder %s17_s10, %s17_s10 }
   0x5   :  { %p90_p0 = scmp.ne.s32.totalorder %s17_s10, %s89_s13  ;;  %p95_p2 = scmp.lt.s32.totalorder %s89_s13, %s89_s13 }
   0x7   :  { %p96_p3 = por %p95_p2, %p94_p1 }
   0x9   :  { %p97_p4 = pnand %p96_p3, %p90_p0 }
   0xb   :  { %100 = shalt.err (!%p97_p4)
}
   0xc   :  { %19 = dma.hbm_to_vmem [thread:$0]  %s175_s0, 64, %s17_s10, [#allocation3]  }
   0xd   :  { %s109_s16 = scalar_lea.vmem %s27_s12, 32  ;;  %p114_p6 = scmp.lt.s32.totalorder %s27_s12, %s27_s12 }
   0xe   :  { %p110_p5 = scmp.ne.s32.totalorder %s27_s12, %s109_s16  ;;  %p115_p7 = scmp.lt.s32.totalorder %s109_s16, %s109_s16 }
  0x10   :  { %p116_p8 = por %p115_p7, %p114_p6 }
  0x12   :  { %p117_p9 = pnand %p116_p8, %p110_p5 }
  0x14   :  { %120 = shalt.err (!%p117_p9)
}
  0x15   :  { %29 = dma.hbm_to_vmem [thread:$0]  %s176_s1, 32, %s27_s12, [#allocation6]  }
  0x16   :  { %141 = dma.done.wait [#allocation3], 64  }
  0x17   :  { %142 = vsyncadd [#allocation3], 4294967232 }
  0x18   :  { %143 = dma.done.wait [#allocation6], 32  }
  0x19   :  { %144 = vsyncadd [#allocation6], 4294967264  ;;  %v39_v0 = vlaneseq  ;;  %v149_v1 = vmov 1983009808   ;;  %v37_v7 = vld [vmem:[#allocation5] sm:$0x3] }
  0x1a   :  { %v49_v2 = vunpack.c.l.s4 %v149_v1  ;;  %vm57_vm0 = vcmask 1041408   ;;  %vm58_vm1 = vcmask 519170   ;;  %v36_v12 = vld [vmem:[#allocation2] sm:$0xf]  ;;  %s150_s0 = smov [#allocation7]  }
  0x1b   :  { %v40_v3 = vshrl.u32 %v39_v0, 7  ;;  %s67_s1 = sshll.u32 %s150_s0, 4  ;;  %vm59_vm2 = vmor %vm58_vm1, %vm57_vm0  ;;  %s68_s1 = int_to_ptr.vmem [resolvable:$true] %s67_s1 }
  0x1c   :  { %v50_v6 = vunpack.c.0.s8 %v49_v2  ;;  %s121_s19 = scalar_lea.vmem %s68_s1, 64  ;;  %p126_p11 = scmp.lt.s32.totalorder %s68_s1, %s68_s1 }
  0x1d   :  { %v41_v4 = vsub.s32 0, %v40_v3  ;;  %v45_v5 = vsub.s32 1, %v40_v3  ;;  %p122_p10 = scmp.ne.s32.totalorder %s68_s1, %s121_s19  ;;  %p127_p12 = scmp.lt.s32.totalorder %s121_s19, %s121_s19 }
  0x1e   :  { %v53_v10 = vsub.s32 %v50_v6, %v40_v3 }
  0x1f   :  { %v42_v8 = vrot.slane %v37_v7, %v41_v4  ;;  %v46_v9 = vrot.slane %v37_v7, %v45_v5  ;;  %p128_p13 = por %p127_p12, %p126_p11 }
  0x21   :  { %v47_v11 = vcombine.low %v42_v8, %v46_v9  ;;  %p129_p0 = pnand %p128_p13, %p122_p10 }
  0x23   :  { %v54_v13 = vrot.slane %v47_v11, %v53_v10 }
  0x25   :  { %v56_v14 = vadd.f32 %v54_v13, %v36_v12 }
  0x27   :  { %60 = vst.msk [vmem:[#allocation7] sm:$0xf] %vm59_vm2, %v56_v14 }
  0x28   :  { %132 = shalt.err (!%p129_p0)
}
  0x29   :  { %70 = dma.vmem_to_hbm [thread:$0]  %s68_s1, 64, %s177_s2, [#allocation4]  }
  0x2a   :  { %145 = dma.done.wait [#allocation4], 64  }
  0x2b   :  { %146 = vsyncadd [#allocation4], 4294967232 }
  0x2c   :  { %74 = vsyncpa [#allocation3], 1 }
  0x2d   :  { %75 = vsyncpa [#allocation6], 1 }
  0x2e   :  { %76 = vsyncpa [#allocation4], 1 }

// kernel: tpu_custom_call.1
= control target key start
LH: loop header
LB: loop body
LE: loop exit
PB: predicated region body
PF: predicated region fallthrough
CT: control target
= control target key end

     0   :  { %7 = vsyncpa [#allocation3], 0  ;;  %s175_s0 = inlined_call_operand.hbm [shape: f32[2,192], index: 0, kind: input, shape index: {}]   ;;  %s176_s1 = inlined_call_operand.hbm [shape: f32[1,192], index: 1, kind: input, shape index: {}]   ;;  %s177_s2 = inlined_call_operand.hbm [shape: f32[2,192], index: 2, kind: output, shape index: {}]  }
   0x1   :  { %8 = vsyncpa [#allocation6], 0 }
   0x2   :  { %9 = vsyncpa [#allocation4], 0  ;;  %s147_s9 = smov [#allocation2]   ;;  %s148_s11 = smov [#allocation5]  }
   0x3   :  { %s16_s10 = sshll.u32 %s147_s9, 4  ;;  %s26_s12 = sshll.u32 %s148_s11, 4  ;;  %s17_s10 = int_to_ptr.vmem [resolvable:$true] %s16_s10  ;;  %s27_s12 = int_to_ptr.vmem [resolvable:$true] %s26_s12 }
   0x4   :  { %s89_s13 = scalar_lea.vmem %s17_s10, 64  ;;  %p94_p1 = scmp.lt.s32.totalorder %s17_s10, %s17_s10 }
   0x5   :  { %p90_p0 = scmp.ne.s32.totalorder %s17_s10, %s89_s13  ;;  %p95_p2 = scmp.lt.s32.totalorder %s89_s13, %s89_s13 }
   0x7   :  { %p96_p3 = por %p95_p2, %p94_p1 }
   0x9   :  { %p97_p4 = pnand %p96_p3, %p90_p0 }
   0xb   :  { %100 = shalt.err (!%p97_p4)
}
   0xc   :  { %19 = dma.hbm_to_vmem [thread:$0]  %s175_s0, 64, %s17_s10, [#allocation3]  }
   0xd   :  { %s109_s16 = scalar_lea.vmem %s27_s12, 32  ;;  %p114_p6 = scmp.lt.s32.totalorder %s27_s12, %s27_s12 }
   0xe   :  { %p110_p5 = scmp.ne.s32.totalorder %s27_s12, %s109_s16  ;;  %p115_p7 = scmp.lt.s32.totalorder %s109_s16, %s109_s16 }
  0x10   :  { %p116_p8 = por %p115_p7, %p114_p6 }
  0x12   :  { %p117_p9 = pnand %p116_p8, %p110_p5 }
  0x14   :  { %120 = shalt.err (!%p117_p9)
}
  0x15   :  { %29 = dma.hbm_to_vmem [thread:$0]  %s176_s1, 32, %s27_s12, [#allocation6]  }
  0x16   :  { %141 = dma.done.wait [#allocation3], 64  }
  0x17   :  { %142 = vsyncadd [#allocation3], 4294967232 }
  0x18   :  { %143 = dma.done.wait [#allocation6], 32  }
  0x19   :  { %144 = vsyncadd [#allocation6], 4294967264  ;;  %v39_v0 = vlaneseq  ;;  %v149_v1 = vmov 1983009808   ;;  %v37_v7 = vld [vmem:[#allocation5] sm:$0x3] }
  0x1a   :  { %v49_v2 = vunpack.c.l.s4 %v149_v1  ;;  %vm57_vm0 = vcmask 1041408   ;;  %vm58_vm1 = vcmask 519170   ;;  %v36_v12 = vld [vmem:[#allocation2] sm:$0xf]  ;;  %s150_s0 = smov [#allocation7]  }
  0x1b   :  { %v40_v3 = vshrl.u32 %v39_v0, 7  ;;  %s67_s1 = sshll.u32 %s150_s0, 4  ;;  %vm59_vm2 = vmor %vm58_vm1, %vm57_vm0  ;;  %s68_s1 = int_to_ptr.vmem [resolvable:$true] %s67_s1 }
  0x1c   :  { %v50_v6 = vunpack.c.0.s8 %v49_v2  ;;  %s121_s19 = scalar_lea.vmem %s68_s1, 64  ;;  %p126_p11 = scmp.lt.s32.totalorder %s68_s1, %s68_s1 }
  0x1d   :  { %v41_v4 = vsub.s32 0, %v40_v3  ;;  %v45_v5 = vsub.s32 1, %v40_v3  ;;  %p122_p10 = scmp.ne.s32.totalorder %s68_s1, %s121_s19  ;;  %p127_p12 = scmp.lt.s32.totalorder %s121_s19, %s121_s19 }
  0x1e   :  { %v53_v10 = vsub.s32 %v50_v6, %v40_v3 }
  0x1f   :  { %v42_v8 = vrot.slane %v37_v7, %v41_v4  ;;  %v46_v9 = vrot.slane %v37_v7, %v45_v5  ;;  %p128_p13 = por %p127_p12, %p126_p11 }
  0x21   :  { %v47_v11 = vcombine.low %v42_v8, %v46_v9  ;;  %p129_p0 = pnand %p128_p13, %p122_p10 }
  0x23   :  { %v54_v13 = vrot.slane %v47_v11, %v53_v10 }
  0x25   :  { %v56_v14 = vadd.f32 %v54_v13, %v36_v12 }
  0x27   :  { %60 = vst.msk [vmem:[#allocation7] sm:$0xf] %vm59_vm2, %v56_v14 }
  0x28   :  { %132 = shalt.err (!%p129_p0)
}
  0x29   :  { %70 = dma.vmem_to_hbm [thread:$0]  %s68_s1, 64, %s177_s2, [#allocation4]  }
  0x2a   :  { %145 = dma.done.wait [#allocation4], 64  }
  0x2b   :  { %146 = vsyncadd [#allocation4], 4294967232 }
  0x2c   :  { %74 = vsyncpa [#allocation3], 1 }
  0x2d   :  { %75 = vsyncpa [#allocation6], 1 }
  0x2e   :  { %76 = vsyncpa [#allocation4], 1 }

</bundles_post_ra>
